<compile_context>
chip_gen: v7x
topology: tpu7x:2x2x1
jax: 0.10.0
libtpu: 0.0.40
codegen_flags: <defaults>
</compile_context>

<pallas_src>
import functools

import jax
import jax.numpy as jnp
from jax.experimental import pallas as pl
from jax.experimental.pallas import tpu as pltpu

FEAT_PAD = 128   # lane width of VMEM-resident activations / weights / biases
IN_PAD = 8       # HBM-side input lane width  (>= 5 real input features)
OUT_PAD = 8      # HBM-side output lane width (>= 3 classes)


def _round_up(x: int, m: int) -> int:
    return (x + m - 1) // m * m


# ---------------------------------------------------------------------------
# Kernel: whole MLP forward for one (TB, .) batch tile. Weights/biases are
# VMEM-resident packed tensors shared by every grid step.
# ---------------------------------------------------------------------------
def _make_wavenet_kernel(num_layers: int, in_pad: int, out_pad: int):
    def kernel(x_ref, w_ref, b_ref, out_ref, xpad_ref):
        # x_ref:    (TB, IN_PAD)   f32  narrow HBM input stream
        # w_ref:    (L, 128, 128)  bf16 zero-padded (in, out) weights
        # b_ref:    (L, 128)       f32  zero-padded biases
        # out_ref:  (TB, OUT_PAD)  f32  narrow HBM output stream
        # xpad_ref: (TB, 128)      f32  VMEM scratch: lane-pad of x
        xpad_ref[...] = jnp.zeros_like(xpad_ref)
        xpad_ref[:, :in_pad] = x_ref[...]
        h = xpad_ref[...].astype(jnp.bfloat16)           # bf16 MXU operand

        acc = None
        for i in range(num_layers):
            # bf16 MXU operands, f32 accumulate; bias-add stays in f32.
            acc = jnp.dot(h, w_ref[i],
                          preferred_element_type=jnp.float32) + b_ref[i:i + 1, :]
            if i < num_layers - 1:
                # LeakyReLU(0.2) on the f32 VPU (mul + max), then one bf16
                # round per layer boundary for the next MXU operand.
                acc = jnp.maximum(acc, 0.2 * acc)
                h = acc.astype(jnp.bfloat16)

        # Only the real class lanes (padded to OUT_PAD) hit HBM.
        out_ref[...] = acc[:, :out_pad]

    return kernel


# ---------------------------------------------------------------------------
# Parameter packing: pad each (in, out) weight / (1, out) bias to 128 lanes
# and stack into one bf16 weight tensor + one f32 bias tensor.
# ---------------------------------------------------------------------------
def pack_params(weights, biases, feat_pad: int = FEAT_PAD):
    L = len(weights)
    w_packed = jnp.zeros((L, feat_pad, feat_pad), dtype=jnp.float32)
    b_packed = jnp.zeros((L, feat_pad), dtype=jnp.float32)
    for i, (w, b) in enumerate(zip(weights, biases)):
        fi, fo = w.shape
        w_packed = w_packed.at[i, :fi, :fo].set(w)
        b_packed = b_packed.at[i, :fo].set(b.reshape(-1))
    return w_packed.astype(jnp.bfloat16), b_packed


# ---------------------------------------------------------------------------
# Wrapper: narrow HBM-side pad of x, 1-D batch grid, narrow output, slice.
# ---------------------------------------------------------------------------
@functools.partial(jax.jit, static_argnames=("num_classes", "block_batch"))
def wavenet_forward(x, w_packed, b_packed, num_classes: int = 3,
                    block_batch: int = 1024):
    B, F = x.shape
    L = w_packed.shape[0]
    assert F <= IN_PAD and num_classes <= OUT_PAD

    # Tile selection: even number of grid steps once B exceeds one block
    # (v7x megacore balance); TB a multiple of 16 (bf16 sublane packing).
    if B <= block_batch:
        n_steps = 1
        TB = _round_up(max(B, 8), 16)
    else:
        n_steps = pl.cdiv(B, block_batch)
        n_steps += n_steps % 2
        TB = _round_up(pl.cdiv(B, n_steps), 16)
    B_pad = TB * n_steps

    # Narrow HBM-side input: (B_pad, IN_PAD) f32 (~32 B/row, not 512 B/row).
    x_in = jnp.zeros((B_pad, IN_PAD), dtype=jnp.float32)
    x_in = x_in.at[:B, :F].set(x.astype(jnp.float32))

    out = pl.pallas_call(
        _make_wavenet_kernel(L, IN_PAD, OUT_PAD),
        out_shape=jax.ShapeDtypeStruct((B_pad, OUT_PAD), jnp.float32),
        grid=(n_steps,),
        in_specs=[
            pl.BlockSpec((TB, IN_PAD), lambda i: (i, 0)),
            pl.BlockSpec((L, FEAT_PAD, FEAT_PAD), lambda i: (0, 0, 0)),
            pl.BlockSpec((L, FEAT_PAD), lambda i: (0, 0)),
        ],
        out_specs=pl.BlockSpec((TB, OUT_PAD), lambda i: (i, 0)),
        scratch_shapes=[pltpu.VMEM((TB, FEAT_PAD), jnp.float32)],
        compiler_params=pltpu.CompilerParams(
            dimension_semantics=("parallel",)),
    )(x_in, w_packed, b_packed)

    return out[:B, :num_classes]


# ---------------------------------------------------------------------------
# Deterministic parameter construction matching WaveNET.__init__:
#   innodes = 5; layer{1,2,3}: planes[k] FClayers -> nodes[k]; fin_fc -> 3.
#   kaiming_normal_(mode='fan_out', nonlinearity='leaky_relu'):
#     std = sqrt(2) / sqrt(out_features); bias ~ U(-1/sqrt(in), 1/sqrt(in)).
# ---------------------------------------------------------------------------
def make_wavenet_params(key, planes, nodes, num_classes=3):
    layer_dims = []
    innodes = 5
    for p, n in zip(planes, nodes):
        layer_dims.append((innodes, n))
        innodes = n
        for _ in range(1, p):
            layer_dims.append((innodes, n))
    layer_dims.append((innodes, num_classes))  # fin_fc

    weights, biases = [], []
    for (fan_in, fan_out) in layer_dims:
        key, kw, kb = jax.random.split(key, 3)
        std = (2.0 ** 0.5) / (fan_out ** 0.5)
        w = std * jax.random.normal(kw, (fan_in, fan_out), dtype=jnp.float32)
        bound = 1.0 / (fan_in ** 0.5)
        b = jax.random.uniform(kb, (1, fan_out), dtype=jnp.float32,
                               minval=-bound, maxval=bound)
        weights.append(w)
        biases.append(b)
    return weights, biases


# Pure-JAX references. mxu_bf16=True matches the kernel math (bf16 MXU
# operands, f32 accumulate / bias / LeakyReLU); mxu_bf16=False is the
# module's pure-f32 math.
def wavenet_ref(x, weights, biases, mxu_bf16=False):
    h = x.astype(jnp.float32)
    n = len(weights)
    for i in range(n):
        if mxu_bf16:
            h = jnp.dot(h.astype(jnp.bfloat16),
                        weights[i].astype(jnp.bfloat16),
                        preferred_element_type=jnp.float32) + biases[i]
        else:
            h = h @ weights[i] + biases[i]
        if i < n - 1:
            h = jnp.maximum(h, 0.2 * h)
    return h


if __name__ == "__main__":
    key = jax.random.PRNGKey(0)

    planes = [2, 2, 2]
    nodes = [32, 32, 32]
    num_classes = 3

    key, kp = jax.random.split(key)
    weights, biases = make_wavenet_params(kp, planes, nodes, num_classes)
    w_packed, b_packed = pack_params(weights, biases)

    # Small batch (matches original test) + a larger batch to exercise the
    # multi-step batch grid / narrow-HBM padding path.
    for batch in (8, 1040):
        key, kx = jax.random.split(key)
        x = jax.random.normal(kx, (batch, 5), dtype=jnp.float32)

        out = wavenet_forward(x, w_packed, b_packed, num_classes=num_classes)
        out = jax.block_until_ready(out)
        assert out.shape == (batch, num_classes)

        ref_bf16 = wavenet_ref(x, weights, biases, mxu_bf16=True)
        ref_f32 = wavenet_ref(x, weights, biases, mxu_bf16=False)
        # Tight check against the bf16-MXU-matched reference.
        assert jnp.allclose(out, ref_bf16, atol=1e-4, rtol=1e-4)
        # Loose check against the pure-f32 module semantics (bf16 rounding).
        assert jnp.allclose(out, ref_f32, atol=1e-1, rtol=5e-2)

    print("KERNEL_OK")
</pallas_src>

<mosaic_0001>
module attributes {stable_mosaic.version = 11 : i64} {
  func.func @kernel(%arg0: i32, %arg1: memref<16x8xf32, #tpu.memory_space<vmem>>, %arg2: memref<7x128x128xbf16, #tpu.memory_space<vmem>>, %arg3: memref<7x128xf32, #tpu.memory_space<vmem>>, %arg4: memref<16x8xf32, #tpu.memory_space<vmem>>, %arg5: memref<16x128xf32, #tpu.memory_space<vmem>>) attributes {dimension_semantics = [#tpu.dimension_semantics<parallel>], iteration_bounds = array<i64: 1>, scalar_prefetch = 0 : i64, scratch_operands = 1 : i64, tpu.core_type = #tpu.core_type<tc>, window_params = [{transform_indices = @transform_0, window_bounds = array<i64: 16, 8>}, {pipeline_mode = #tpu.pipeline_mode<synchronous>, transform_indices = @transform_1, window_bounds = array<i64: 7, 128, 128>}, {pipeline_mode = #tpu.pipeline_mode<synchronous>, transform_indices = @transform_2, window_bounds = array<i64: 7, 128>}, {transform_indices = @transform_3, window_bounds = array<i64: 16, 8>}]} {
    %cst = arith.constant 0.000000e+00 : f32
    %0 = vector.broadcast %cst : f32 to vector<16x128xf32>
    %c0 = arith.constant 0 : index
    %c0_0 = arith.constant 0 : index
    %1 = vector.load %arg5[%c0, %c0_0] : memref<16x128xf32, #tpu.memory_space<vmem>>, vector<16x128xf32>
    tpu.vector_store %arg5[%c0, %c0_0], %0 {strides = array<i32>} : memref<16x128xf32, #tpu.memory_space<vmem>>, vector<16x128xf32>,
    %c0_1 = arith.constant 0 : index
    %c0_2 = arith.constant 0 : index
    %2 = vector.load %arg1[%c0_1, %c0_2] : memref<16x8xf32, #tpu.memory_space<vmem>>, vector<16x8xf32>
    %c0_3 = arith.constant 0 : index
    %c0_4 = arith.constant 0 : index
    %3 = vector.load %arg5[%c0_3, %c0_4] : memref<16x128xf32, #tpu.memory_space<vmem>>, vector<16x8xf32>
    tpu.vector_store %arg5[%c0_3, %c0_4], %2 {strides = array<i32>} : memref<16x128xf32, #tpu.memory_space<vmem>>, vector<16x8xf32>,
    %c0_5 = arith.constant 0 : index
    %c0_6 = arith.constant 0 : index
    %4 = vector.load %arg5[%c0_5, %c0_6] : memref<16x128xf32, #tpu.memory_space<vmem>>, vector<16x128xf32>
    %5 = arith.truncf %4 : vector<16x128xf32> to vector<16x128xbf16>
    %c0_7 = arith.constant 0 : index
    %c0_8 = arith.constant 0 : index
    %c0_9 = arith.constant 0 : index
    %6 = vector.load %arg2[%c0_7, %c0_8, %c0_9] : memref<7x128x128xbf16, #tpu.memory_space<vmem>>, vector<1x128x128xbf16>
    %7 = vector.shape_cast %6 : vector<1x128x128xbf16> to vector<128x128xbf16>
    %cst_10 = arith.constant dense<0.000000e+00> : vector<16x128xf32>
    %8 = tpu.matmul %5, %7, %cst_10 {dimension_numbers = #tpu.dot_dimension_numbers<[1], [0], [0], [1], [0, 0, 1, 1], [], []>} : vector<16x128xbf16>, vector<128x128xbf16>, vector<16x128xf32> -> vector<16x128xf32>
    %c0_11 = arith.constant 0 : index
    %c0_12 = arith.constant 0 : index
    %9 = vector.load %arg3[%c0_11, %c0_12] : memref<7x128xf32, #tpu.memory_space<vmem>>, vector<1x128xf32>
    %10 = vector.broadcast %9 : vector<1x128xf32> to vector<16x128xf32>
    %11 = arith.addf %8, %10 : vector<16x128xf32>
    %cst_13 = arith.constant 2.000000e-01 : f32
    %12 = vector.broadcast %cst_13 : f32 to vector<16x128xf32>
    %13 = arith.mulf %12, %11 : vector<16x128xf32>
    %14 = arith.maximumf %11, %13 : vector<16x128xf32>
    %15 = arith.truncf %14 : vector<16x128xf32> to vector<16x128xbf16>
    %c1 = arith.constant 1 : index
    %c0_14 = arith.constant 0 : index
    %c0_15 = arith.constant 0 : index
    %16 = vector.load %arg2[%c1, %c0_14, %c0_15] : memref<7x128x128xbf16, #tpu.memory_space<vmem>>, vector<1x128x128xbf16>
    %17 = vector.shape_cast %16 : vector<1x128x128xbf16> to vector<128x128xbf16>
    %cst_16 = arith.constant dense<0.000000e+00> : vector<16x128xf32>
    %18 = tpu.matmul %15, %17, %cst_16 {dimension_numbers = #tpu.dot_dimension_numbers<[1], [0], [0], [1], [0, 0, 1, 1], [], []>} : vector<16x128xbf16>, vector<128x128xbf16>, vector<16x128xf32> -> vector<16x128xf32>
    %c1_17 = arith.constant 1 : index
    %c0_18 = arith.constant 0 : index
    %19 = vector.load %arg3[%c1_17, %c0_18] : memref<7x128xf32, #tpu.memory_space<vmem>>, vector<1x128xf32>
    %20 = vector.broadcast %19 : vector<1x128xf32> to vector<16x128xf32>
    %21 = arith.addf %18, %20 : vector<16x128xf32>
    %cst_19 = arith.constant 2.000000e-01 : f32
    %22 = vector.broadcast %cst_19 : f32 to vector<16x128xf32>
    %23 = arith.mulf %22, %21 : vector<16x128xf32>
    %24 = arith.maximumf %21, %23 : vector<16x128xf32>
    %25 = arith.truncf %24 : vector<16x128xf32> to vector<16x128xbf16>
    %c2 = arith.constant 2 : index
    %c0_20 = arith.constant 0 : index
    %c0_21 = arith.constant 0 : index
    %26 = vector.load %arg2[%c2, %c0_20, %c0_21] : memref<7x128x128xbf16, #tpu.memory_space<vmem>>, vector<1x128x128xbf16>
    %27 = vector.shape_cast %26 : vector<1x128x128xbf16> to vector<128x128xbf16>
    %cst_22 = arith.constant dense<0.000000e+00> : vector<16x128xf32>
    %28 = tpu.matmul %25, %27, %cst_22 {dimension_numbers = #tpu.dot_dimension_numbers<[1], [0], [0], [1], [0, 0, 1, 1], [], []>} : vector<16x128xbf16>, vector<128x128xbf16>, vector<16x128xf32> -> vector<16x128xf32>
    %c2_23 = arith.constant 2 : index
    %c0_24 = arith.constant 0 : index
    %29 = vector.load %arg3[%c2_23, %c0_24] : memref<7x128xf32, #tpu.memory_space<vmem>>, vector<1x128xf32>
    %30 = vector.broadcast %29 : vector<1x128xf32> to vector<16x128xf32>
    %31 = arith.addf %28, %30 : vector<16x128xf32>
    %cst_25 = arith.constant 2.000000e-01 : f32
    %32 = vector.broadcast %cst_25 : f32 to vector<16x128xf32>
    %33 = arith.mulf %32, %31 : vector<16x128xf32>
    %34 = arith.maximumf %31, %33 : vector<16x128xf32>
    %35 = arith.truncf %34 : vector<16x128xf32> to vector<16x128xbf16>
    %c3 = arith.constant 3 : index
    %c0_26 = arith.constant 0 : index
    %c0_27 = arith.constant 0 : index
    %36 = vector.load %arg2[%c3, %c0_26, %c0_27] : memref<7x128x128xbf16, #tpu.memory_space<vmem>>, vector<1x128x128xbf16>
    %37 = vector.shape_cast %36 : vector<1x128x128xbf16> to vector<128x128xbf16>
    %cst_28 = arith.constant dense<0.000000e+00> : vector<16x128xf32>
    %38 = tpu.matmul %35, %37, %cst_28 {dimension_numbers = #tpu.dot_dimension_numbers<[1], [0], [0], [1], [0, 0, 1, 1], [], []>} : vector<16x128xbf16>, vector<128x128xbf16>, vector<16x128xf32> -> vector<16x128xf32>
    %c3_29 = arith.constant 3 : index
    %c0_30 = arith.constant 0 : index
    %39 = vector.load %arg3[%c3_29, %c0_30] : memref<7x128xf32, #tpu.memory_space<vmem>>, vector<1x128xf32>
    %40 = vector.broadcast %39 : vector<1x128xf32> to vector<16x128xf32>
    %41 = arith.addf %38, %40 : vector<16x128xf32>
    %cst_31 = arith.constant 2.000000e-01 : f32
    %42 = vector.broadcast %cst_31 : f32 to vector<16x128xf32>
    %43 = arith.mulf %42, %41 : vector<16x128xf32>
    %44 = arith.maximumf %41, %43 : vector<16x128xf32>
    %45 = arith.truncf %44 : vector<16x128xf32> to vector<16x128xbf16>
    %c4 = arith.constant 4 : index
    %c0_32 = arith.constant 0 : index
    %c0_33 = arith.constant 0 : index
    %46 = vector.load %arg2[%c4, %c0_32, %c0_33] : memref<7x128x128xbf16, #tpu.memory_space<vmem>>, vector<1x128x128xbf16>
    %47 = vector.shape_cast %46 : vector<1x128x128xbf16> to vector<128x128xbf16>
    %cst_34 = arith.constant dense<0.000000e+00> : vector<16x128xf32>
    %48 = tpu.matmul %45, %47, %cst_34 {dimension_numbers = #tpu.dot_dimension_numbers<[1], [0], [0], [1], [0, 0, 1, 1], [], []>} : vector<16x128xbf16>, vector<128x128xbf16>, vector<16x128xf32> -> vector<16x128xf32>
    %c4_35 = arith.constant 4 : index
    %c0_36 = arith.constant 0 : index
    %49 = vector.load %arg3[%c4_35, %c0_36] : memref<7x128xf32, #tpu.memory_space<vmem>>, vector<1x128xf32>
    %50 = vector.broadcast %49 : vector<1x128xf32> to vector<16x128xf32>
    %51 = arith.addf %48, %50 : vector<16x128xf32>
    %cst_37 = arith.constant 2.000000e-01 : f32
    %52 = vector.broadcast %cst_37 : f32 to vector<16x128xf32>
    %53 = arith.mulf %52, %51 : vector<16x128xf32>
    %54 = arith.maximumf %51, %53 : vector<16x128xf32>
    %55 = arith.truncf %54 : vector<16x128xf32> to vector<16x128xbf16>
    %c5 = arith.constant 5 : index
    %c0_38 = arith.constant 0 : index
    %c0_39 = arith.constant 0 : index
    %56 = vector.load %arg2[%c5, %c0_38, %c0_39] : memref<7x128x128xbf16, #tpu.memory_space<vmem>>, vector<1x128x128xbf16>
    %57 = vector.shape_cast %56 : vector<1x128x128xbf16> to vector<128x128xbf16>
    %cst_40 = arith.constant dense<0.000000e+00> : vector<16x128xf32>
    %58 = tpu.matmul %55, %57, %cst_40 {dimension_numbers = #tpu.dot_dimension_numbers<[1], [0], [0], [1], [0, 0, 1, 1], [], []>} : vector<16x128xbf16>, vector<128x128xbf16>, vector<16x128xf32> -> vector<16x128xf32>
    %c5_41 = arith.constant 5 : index
    %c0_42 = arith.constant 0 : index
    %59 = vector.load %arg3[%c5_41, %c0_42] : memref<7x128xf32, #tpu.memory_space<vmem>>, vector<1x128xf32>
    %60 = vector.broadcast %59 : vector<1x128xf32> to vector<16x128xf32>
    %61 = arith.addf %58, %60 : vector<16x128xf32>
    %cst_43 = arith.constant 2.000000e-01 : f32
    %62 = vector.broadcast %cst_43 : f32 to vector<16x128xf32>
    %63 = arith.mulf %62, %61 : vector<16x128xf32>
    %64 = arith.maximumf %61, %63 : vector<16x128xf32>
    %65 = arith.truncf %64 : vector<16x128xf32> to vector<16x128xbf16>
    %c6 = arith.constant 6 : index
    %c0_44 = arith.constant 0 : index
    %c0_45 = arith.constant 0 : index
    %66 = vector.load %arg2[%c6, %c0_44, %c0_45] : memref<7x128x128xbf16, #tpu.memory_space<vmem>>, vector<1x128x128xbf16>
    %67 = vector.shape_cast %66 : vector<1x128x128xbf16> to vector<128x128xbf16>
    %cst_46 = arith.constant dense<0.000000e+00> : vector<16x128xf32>
    %68 = tpu.matmul %65, %67, %cst_46 {dimension_numbers = #tpu.dot_dimension_numbers<[1], [0], [0], [1], [0, 0, 1, 1], [], []>} : vector<16x128xbf16>, vector<128x128xbf16>, vector<16x128xf32> -> vector<16x128xf32>
    %c6_47 = arith.constant 6 : index
    %c0_48 = arith.constant 0 : index
    %69 = vector.load %arg3[%c6_47, %c0_48] : memref<7x128xf32, #tpu.memory_space<vmem>>, vector<1x128xf32>
    %70 = vector.broadcast %69 : vector<1x128xf32> to vector<16x128xf32>
    %71 = arith.addf %68, %70 : vector<16x128xf32>
    %72 = vector.extract_strided_slice %71 {offsets = [0, 0], sizes = [16, 8], strides = [1, 1]} : vector<16x128xf32> to vector<16x8xf32>
    %c0_49 = arith.constant 0 : index
    %c0_50 = arith.constant 0 : index
    %73 = vector.load %arg4[%c0_49, %c0_50] : memref<16x8xf32, #tpu.memory_space<vmem>>, vector<16x8xf32>
    tpu.vector_store %arg4[%c0_49, %c0_50], %72 {strides = array<i32>} : memref<16x8xf32, #tpu.memory_space<vmem>>, vector<16x8xf32>,
    return
  }
  func.func @transform_0(%arg0: i32) -> (i32, i32) {
    %c0_i32 = arith.constant 0 : i32
    %c0_i32_0 = arith.constant 0 : i32
    return %arg0, %c0_i32 : i32, i32
  }
  func.func @transform_1(%arg0: i32) -> (i32, i32, i32) {
    %c0_i32 = arith.constant 0 : i32
    %c0_i32_0 = arith.constant 0 : i32
    %c0_i32_1 = arith.constant 0 : i32
    %c0_i32_2 = arith.constant 0 : i32
    return %c0_i32, %c0_i32_0, %c0_i32_1 : i32, i32, i32
  }
  func.func @transform_2(%arg0: i32) -> (i32, i32) {
    %c0_i32 = arith.constant 0 : i32
    %c0_i32_0 = arith.constant 0 : i32
    %c0_i32_1 = arith.constant 0 : i32
    return %c0_i32, %c0_i32_0 : i32, i32
  }
  func.func @transform_3(%arg0: i32) -> (i32, i32) {
    %c0_i32 = arith.constant 0 : i32
    %c0_i32_0 = arith.constant 0 : i32
    return %arg0, %c0_i32 : i32, i32
  }
}

</mosaic_0001>

<bundles_post_ra>
// kernel: wavenet_forward.1
= control target key start
LH: loop header
LB: loop body
LE: loop exit
PB: predicated region body
PF: predicated region fallthrough
CT: control target
= control target key end

     0   :  { %8 = vsyncpa [#allocation4], 0  ;;  %s1203_s12 = smov [#allocation3]   ;;  %s1349_s0 = inlined_call_operand.vmem [shape: f32[16,8], index: 0, kind: input, shape index: {}]   ;;  %s1350_s1 = inlined_call_operand.hbm [shape: bf16[7,128,128], index: 1, kind: input, shape index: {}]   ;;  %s1351_s2 = inlined_call_operand.vmem [shape: f32[7,128], index: 2, kind: input, shape index: {}]   ;;  %s1352_s3 = inlined_call_operand.vmem [shape: f32[16,8], index: 3, kind: output, shape index: {}]  }
   0x1   :  { %s16_s13 = sshll.u32 %s1203_s12, 4  ;;  %s1179_s16 = scalar_lea.hbm %s1350_s1, 7168  ;;  %s17_s13 = int_to_ptr.vmem [resolvable:$true] %s16_s13 }
   0x2   :  { %p1180_p0 = scmp.ne.s32.totalorder %s1350_s1, %s1179_s16  ;;  %p1183_p1 = scmp.lt.u32.totalorder %s1179_s16, %s1350_s1 }
   0x4   :  { %p1185_p2 = pnand %p1183_p1, %p1180_p0 }
   0x6   :  { %1188 = shalt.err (!%p1185_p2)
}
   0x7   :  { %s1189_s21 = scalar_lea.vmem %s17_s13, 7168  ;;  %p1194_p4 = scmp.lt.s32.totalorder %s17_s13, %s17_s13 }
   0x8   :  { %p1190_p3 = scmp.ne.s32.totalorder %s17_s13, %s1189_s21  ;;  %p1195_p5 = scmp.lt.s32.totalorder %s1189_s21, %s1189_s21 }
   0xa   :  { %p1196_p6 = por %p1195_p5, %p1194_p4 }
   0xc   :  { %p1197_p7 = pnand %p1196_p6, %p1190_p3 }
   0xe   :  { %1200 = shalt.err (!%p1197_p7)
}
   0xf   :  { %s1204_s22 = smov 64   ;;  %s1205_s23 = smov 4  }
  0x10   :  { %22 = dma.hbm_to_vmem [thread:$0]  %s1350_s1, 7168, %s17_s13, [#allocation4], %s1204_s22, %s1204_s22, %s1205_s23  }
  0x11   :  { %1201 = dma.done.wait [#allocation4], 7168  }
  0x12   :  { %1202 = vsyncadd [#allocation4], 4294960128  ;;  %v1206_v0 = vmov 0.0   ;;  %vm1207_vm0 = vmmov 0   ;;  %v1123_v1 = vld [vmem:[#allocation3] sm:$0xff]   ;;  %v1124_v2 = vld [vmem:[#allocation3 + $0x8] sm:$0xff]  }
  0x13   :  { %978 = vmatprep.subr.bf16.mxu0 %v1206_v0  ;;  %29 = vst [vmem:[#allocation2] sm:$0xff] %v1206_v0  ;;  %30 = vst [vmem:[#allocation2 + $0x8] sm:$0xff] %v1206_v0  ;;  %994 = vmatprep.mubr.msk.bf16.mxu0 %vm1207_vm0, %v1206_v0  ;;  %v1125_v3 = vld [vmem:[#allocation3 + $0x10] sm:$0xff]   ;;  %vm33_vm1 = vcmask 64512   ;;  %v32_v5 = vld [vmem:[%s1349_s0 + $0x8] sm:$0xff] }
  0x14   :  { %998 = vmatprep.subr.bf16.mxu1 %v1206_v0  ;;  %1014 = vmatprep.mubr.msk.bf16.mxu1 %vm1207_vm0, %v1206_v0  ;;  %v31_v4 = vld [vmem:[%s1349_s0] sm:$0xff]  ;;  %35 = vst.msk [vmem:[#allocation2 + $0x8] sm:$0xff] %vm33_vm1, %v32_v5  ;;  %v1131_v6 = vld [vmem:[#allocation3 + $0x40] sm:$0xff]   ;;  %v1126_v7 = vld [vmem:[#allocation3 + $0x18] sm:$0xff]  }
  0x15   :  { %979 = vmatpush3.bf16.msra.mxu0 %v1123_v1  ;;  %34 = vst.msk [vmem:[#allocation2] sm:$0xff] %vm33_vm1, %v31_v4  ;;  %999 = vmatpush3.bf16.msra.mxu1 %v1131_v6  ;;  %v1132_v8 = vld [vmem:[#allocation3 + $0x48] sm:$0xff]   ;;  %v1127_v9 = vld [vmem:[#allocation3 + $0x20] sm:$0xff]   ;;  %v1133_v10 = vld [vmem:[#allocation3 + $0x50] sm:$0xff]  }
  0x16   :  { %980 = vmatprep.subr.bf16.mxu0 %v1206_v0  ;;  %1000 = vmatprep.subr.bf16.mxu1 %v1206_v0  ;;  %v1128_v11 = vld [vmem:[#allocation3 + $0x28] sm:$0xff]   ;;  %v1134_v12 = vld [vmem:[#allocation3 + $0x58] sm:$0xff]   ;;  %v1129_v13 = vld [vmem:[#allocation3 + $0x30] sm:$0xff]  }
  0x17   :  { %v1135_v14 = vld [vmem:[#allocation3 + $0x60] sm:$0xff]   ;;  %v1130_v15 = vld [vmem:[#allocation3 + $0x38] sm:$0xff]   ;;  %v1136_v19 = vld [vmem:[#allocation3 + $0x68] sm:$0xff]  }
  0x18   :  { %v1137_v20 = vld [vmem:[#allocation3 + $0x70] sm:$0xff]   ;;  %v1138_v21 = vld [vmem:[#allocation3 + $0x78] sm:$0xff]   ;;  %v1139_v22 = vld [vmem:[#allocation3 + $0x80] sm:$0xff]  }
  0x19   :  { %981 = vmatpush3.bf16.msra.mxu0 %v1124_v2  ;;  %1001 = vmatpush3.bf16.msra.mxu1 %v1132_v8  ;;  %v1140_v23 = vld [vmem:[#allocation3 + $0x88] sm:$0xff]   ;;  %v1141_v24 = vld [vmem:[#allocation3 + $0x90] sm:$0xff]   ;;  %v1142_v25 = vld [vmem:[#allocation3 + $0x98] sm:$0xff]  }
  0x1a   :  { %982 = vmatprep.subr.bf16.mxu0 %v1206_v0  ;;  %1002 = vmatprep.subr.bf16.mxu1 %v1206_v0  ;;  %v1143_v26 = vld [vmem:[#allocation3 + $0xa0] sm:$0xff]   ;;  %v852_v27 = vld [vmem:[%s1351_s2] ss:$0 sm:$0xff]  ;;  %v1144_v39 = vld [vmem:[#allocation3 + $0xa8] sm:$0xff]  }
  0x1b   :  { %v37_v17 = vld [vmem:[#allocation2 + $0x8] sm:$0xff]  ;;  %v1145_v40 = vld [vmem:[#allocation3 + $0xb0] sm:$0xff]   ;;  %v1147_v42 = vld [vmem:[#allocation3 + $0xc0] sm:$0xff]  }
  0x1c   :  { %v36_v16 = vld [vmem:[#allocation2] sm:$0xff]  ;;  %v1146_v41 = vld [vmem:[#allocation3 + $0xb8] sm:$0xff]   ;;  %v1148_v43 = vld [vmem:[#allocation3 + $0xc8] sm:$0xff]  }
  0x1d   :  { %983 = vmatpush3.bf16.msra.mxu0 %v1125_v3  ;;  %1003 = vmatpush3.bf16.msra.mxu1 %v1133_v10  ;;  %v38_v18 = vpack.c.bf16 %v37_v17, %v36_v16  ;;  %v1149_v44 = vld [vmem:[#allocation3 + $0xd0] sm:$0xff]   ;;  %v1150_v45 = vld [vmem:[#allocation3 + $0xd8] sm:$0xff]   ;;  %v1151_v46 = vld [vmem:[#allocation3 + $0xe0] sm:$0xff]  }
  0x1e   :  { %984 = vmatprep.subr.bf16.mxu0 %v1206_v0  ;;  %1004 = vmatprep.subr.bf16.mxu1 %v1206_v0  ;;  %v861_v47 = vld [vmem:[%s1351_s2 + $0x1] ss:$0 sm:$0xff]  ;;  %v1152_v59 = vld [vmem:[#allocation3 + $0xe8] sm:$0xff]   ;;  %v1154_v61 = vld [vmem:[#allocation3 + $0xf8] sm:$0xff]  }
  0x1f   :  { %v1153_v60 = vld [vmem:[#allocation3 + $0xf0] sm:$0xff]   ;;  %v1155_v62 = vld [vmem:[#allocation3 + $0x100] sm:$0xff]   ;;  %v1156_v63 = vld [vmem:[#allocation3 + $0x108] sm:$0xff]  }
  0x20   :  { %v1157_v1 = vld [vmem:[#allocation3 + $0x110] sm:$0xff]   ;;  %v1158_v2 = vld [vmem:[#allocation3 + $0x118] sm:$0xff]   ;;  %v1159_v3 = vld [vmem:[#allocation3 + $0x120] sm:$0xff]  }
  0x21   :  { %985 = vmatpush3.bf16.msra.mxu0 %v1126_v7  ;;  %1005 = vmatpush3.bf16.msra.mxu1 %v1134_v12  ;;  %v870_v4 = vld [vmem:[%s1351_s2 + $0x2] ss:$0 sm:$0xff]  ;;  %v1160_v16 = vld [vmem:[#allocation3 + $0x128] sm:$0xff]  }
  0x22   :  { %986 = vmatprep.subr.bf16.mxu0 %v1206_v0  ;;  %1006 = vmatprep.subr.bf16.mxu1 %v1206_v0  ;;  %v1161_v17 = vld [vmem:[#allocation3 + $0x130] sm:$0xff]  }
  0x25   :  { %987 = vmatpush3.bf16.msra.mxu0 %v1127_v9  ;;  %1007 = vmatpush3.bf16.msra.mxu1 %v1135_v14 }
  0x26   :  { %988 = vmatprep.subr.bf16.mxu0 %v1206_v0  ;;  %1008 = vmatprep.subr.bf16.mxu1 %v1206_v0 }
  0x29   :  { %989 = vmatpush3.bf16.msra.mxu0 %v1128_v11  ;;  %1009 = vmatpush3.bf16.msra.mxu1 %v1136_v19  ;;  %v1163_v19 = vld [vmem:[#allocation3 + $0x140] sm:$0xff]  }
  0x2a   :  { %990 = vmatprep.subr.bf16.mxu0 %v1206_v0  ;;  %1010 = vmatprep.subr.bf16.mxu1 %v1206_v0 }
  0x2d   :  { %991 = vmatpush3.bf16.msra.mxu0 %v1129_v13  ;;  %1011 = vmatpush3.bf16.msra.mxu1 %v1137_v20  ;;  %v1164_v20 = vld [vmem:[#allocation3 + $0x148] sm:$0xff]  }
  0x2e   :  { %992 = vmatprep.subr.bf16.mxu0 %v1206_v0  ;;  %1012 = vmatprep.subr.bf16.mxu1 %v1206_v0 }
  0x31   :  { %993 = vmatpush3.bf16.msra.mxu0 %v1130_v15  ;;  %1013 = vmatpush3.bf16.msra.mxu1 %v1138_v21  ;;  %v1165_v21 = vld [vmem:[#allocation3 + $0x150] sm:$0xff]  }
  0x32   :  { %1018 = vmatprep.subr.bf16.mxu0 %v1206_v0  ;;  %1038 = vmatprep.subr.bf16.mxu1 %v1206_v0 }
  0x34   :  { %995 = vmatmul.mubr.bf16.vlgmr.msra.gmra.mrb[0].mxu0 %v38_v18  ;;  %v1162_v18 = vld [vmem:[#allocation3 + $0x138] sm:$0xff]  }
  0x35   :  { %1034 = vmatprep.mubr.msk.bf16.mxu0 %vm1207_vm0, %v1206_v0  ;;  %1019 = vmatpush3.bf16.msra.mxu0 %v1139_v22  ;;  %v1166_v22 = vld [vmem:[#allocation3 + $0x158] sm:$0xff]  }
  0x36   :  { %1020 = vmatprep.subr.bf16.mxu0 %v1206_v0 }
  0x39   :  { %1021 = vmatpush3.bf16.msra.mxu0 %v1140_v23  ;;  %v1167_v23 = vld [vmem:[#allocation3 + $0x160] sm:$0xff]  }
  0x3a   :  { %1022 = vmatprep.subr.bf16.mxu0 %v1206_v0 }
  0x3d   :  { %1023 = vmatpush3.bf16.msra.mxu0 %v1141_v24  ;;  %v879_v24 = vld [vmem:[%s1351_s2 + $0x3] ss:$0 sm:$0xff] }
  0x3e   :  { %1024 = vmatprep.subr.bf16.mxu0 %v1206_v0 }
  0x41   :  { %1025 = vmatpush3.bf16.msra.mxu0 %v1142_v25 }
  0x42   :  { %1026 = vmatprep.subr.bf16.mxu0 %v1206_v0 }
  0x45   :  { %1027 = vmatpush3.bf16.msra.mxu0 %v1143_v26 }
  0x46   :  { %1028 = vmatprep.subr.bf16.mxu0 %v1206_v0 }
  0x49   :  { %1029 = vmatpush3.bf16.msra.mxu0 %v1144_v39  ;;  %v1171_v39 = vld [vmem:[#allocation3 + $0x180] sm:$0xff]  }
  0x4a   :  { %1030 = vmatprep.subr.bf16.mxu0 %v1206_v0 }
  0x4d   :  { %1031 = vmatpush3.bf16.msra.mxu0 %v1145_v40  ;;  %v1172_v40 = vld [vmem:[#allocation3 + $0x188] sm:$0xff]  }
  0x4e   :  { %1032 = vmatprep.subr.bf16.mxu0 %v1206_v0 }
  0x51   :  { %1033 = vmatpush3.bf16.msra.mxu0 %v1146_v41  ;;  %v1173_v41 = vld [vmem:[#allocation3 + $0x190] sm:$0xff]  }
  0x52   :  { %1058 = vmatprep.subr.bf16.mxu0 %v1206_v0 }
 0x107   :  { %v142_v28 = vpop.f32.mrb[0].mxu0 }
 0x108   :  { %v143_v29 = vadd.f32 %v852_v27, %v142_v28  ;;  %v996_v30 = vpop.f32.mrb[1].mxu0 }
 0x109   :  { %v145_v31 = vpop.f32.mrb[2].mxu0 }
 0x10a   :  { %v149_v32 = vmul.f32 0.2, %v143_v29  ;;  %v146_v33 = vadd.f32 %v852_v27, %v145_v31  ;;  %v997_v34 = vpop.f32.mrb[3].mxu0 }
 0x10c   :  { %v150_v35 = vmul.f32 0.2, %v146_v33  ;;  %v151_v36 = vmax.f32 %v143_v29, %v149_v32 }
 0x10e   :  { %v152_v37 = vmax.f32 %v146_v33, %v150_v35 }
 0x110   :  { %v153_v38 = vpack.c.bf16 %v152_v37, %v151_v36  ;;  %v1168_v36 = vld [vmem:[#allocation3 + $0x168] sm:$0xff]   ;;  %v1169_v37 = vld [vmem:[#allocation3 + $0x170] sm:$0xff]  }
 0x112   :  { %1015 = vmatmul.mubr.bf16.vlgmr.msra.gmra.mrb[0].mxu1 %v153_v38  ;;  %v1170_v38 = vld [vmem:[#allocation3 + $0x178] sm:$0xff]  }
 0x113   :  { %1054 = vmatprep.mubr.msk.bf16.mxu1 %vm1207_vm0, %v1206_v0  ;;  %1039 = vmatpush3.bf16.msra.mxu1 %v1147_v42  ;;  %v1174_v42 = vld [vmem:[#allocation3 + $0x198] sm:$0xff]  }
 0x114   :  { %1040 = vmatprep.subr.bf16.mxu1 %v1206_v0 }
 0x117   :  { %1041 = vmatpush3.bf16.msra.mxu1 %v1148_v43  ;;  %v1175_v43 = vld [vmem:[#allocation3 + $0x1a0] sm:$0xff]  }
 0x118   :  { %1042 = vmatprep.subr.bf16.mxu1 %v1206_v0 }
 0x11b   :  { %1043 = vmatpush3.bf16.msra.mxu1 %v1149_v44  ;;  %v888_v44 = vld [vmem:[%s1351_s2 + $0x4] ss:$0 sm:$0xff] }
 0x11c   :  { %1044 = vmatprep.subr.bf16.mxu1 %v1206_v0 }
 0x11f   :  { %1045 = vmatpush3.bf16.msra.mxu1 %v1150_v45 }
 0x120   :  { %1046 = vmatprep.subr.bf16.mxu1 %v1206_v0 }
 0x123   :  { %1047 = vmatpush3.bf16.msra.mxu1 %v1151_v46 }
 0x124   :  { %1048 = vmatprep.subr.bf16.mxu1 %v1206_v0 }
 0x127   :  { %1049 = vmatpush3.bf16.msra.mxu1 %v1152_v59  ;;  %v897_v59 = vld [vmem:[%s1351_s2 + $0x5] ss:$0 sm:$0xff] }
 0x128   :  { %1050 = vmatprep.subr.bf16.mxu1 %v1206_v0 }
 0x12b   :  { %1051 = vmatpush3.bf16.msra.mxu1 %v1153_v60 }
 0x12c   :  { %1052 = vmatprep.subr.bf16.mxu1 %v1206_v0 }
 0x12f   :  { %1053 = vmatpush3.bf16.msra.mxu1 %v1154_v61 }
 0x130   :  { %1078 = vmatprep.subr.bf16.mxu1 %v1206_v0 }
 0x1e5   :  { %v258_v48 = vpop.f32.mrb[0].mxu1 }
 0x1e6   :  { %v259_v49 = vadd.f32 %v861_v47, %v258_v48  ;;  %v1016_v50 = vpop.f32.mrb[1].mxu1 }
 0x1e7   :  { %v261_v51 = vpop.f32.mrb[2].mxu1 }
 0x1e8   :  { %v265_v52 = vmul.f32 0.2, %v259_v49  ;;  %v262_v53 = vadd.f32 %v861_v47, %v261_v51  ;;  %v1017_v54 = vpop.f32.mrb[3].mxu1 }
 0x1ea   :  { %v266_v55 = vmul.f32 0.2, %v262_v53  ;;  %v267_v56 = vmax.f32 %v259_v49, %v265_v52 }
 0x1ec   :  { %v268_v57 = vmax.f32 %v262_v53, %v266_v55 }
 0x1ee   :  { %v269_v58 = vpack.c.bf16 %v268_v57, %v267_v56  ;;  %v1176_v56 = vld [vmem:[#allocation3 + $0x1a8] sm:$0xff]   ;;  %v1177_v57 = vld [vmem:[#allocation3 + $0x1b0] sm:$0xff]  }
 0x1f0   :  { %1035 = vmatmul.mubr.bf16.vlgmr.msra.gmra.mrb[4].mxu0 %v269_v58  ;;  %v1178_v58 = vld [vmem:[#allocation3 + $0x1b8] sm:$0xff]  }
 0x1f1   :  { %1074 = vmatprep.mubr.msk.bf16.mxu0 %vm1207_vm0, %v1206_v0  ;;  %1059 = vmatpush3.bf16.msra.mxu0 %v1155_v62 }
 0x1f2   :  { %1060 = vmatprep.subr.bf16.mxu0 %v1206_v0 }
 0x1f5   :  { %1061 = vmatpush3.bf16.msra.mxu0 %v1156_v63 }
 0x1f6   :  { %1062 = vmatprep.subr.bf16.mxu0 %v1206_v0 }
 0x1f9   :  { %1063 = vmatpush3.bf16.msra.mxu0 %v1157_v1 }
 0x1fa   :  { %1064 = vmatprep.subr.bf16.mxu0 %v1206_v0 }
 0x1fd   :  { %1065 = vmatpush3.bf16.msra.mxu0 %v1158_v2 }
 0x1fe   :  { %1066 = vmatprep.subr.bf16.mxu0 %v1206_v0 }
 0x201   :  { %1067 = vmatpush3.bf16.msra.mxu0 %v1159_v3 }
 0x202   :  { %1068 = vmatprep.subr.bf16.mxu0 %v1206_v0 }
 0x205   :  { %1069 = vmatpush3.bf16.msra.mxu0 %v1160_v16 }
 0x206   :  { %1070 = vmatprep.subr.bf16.mxu0 %v1206_v0 }
 0x209   :  { %1071 = vmatpush3.bf16.msra.mxu0 %v1161_v17 }
 0x20a   :  { %1072 = vmatprep.subr.bf16.mxu0 %v1206_v0 }
 0x20d   :  { %1073 = vmatpush3.bf16.msra.mxu0 %v1162_v18 }
 0x20e   :  { %1098 = vmatprep.subr.bf16.mxu0 %v1206_v0 }
 0x2c3   :  { %v374_v5 = vpop.f32.mrb[4].mxu0 }
 0x2c4   :  { %v375_v6 = vadd.f32 %v870_v4, %v374_v5  ;;  %v1036_v7 = vpop.f32.mrb[5].mxu0 }
 0x2c5   :  { %v377_v8 = vpop.f32.mrb[6].mxu0 }
 0x2c6   :  { %v381_v9 = vmul.f32 0.2, %v375_v6  ;;  %v378_v10 = vadd.f32 %v870_v4, %v377_v8  ;;  %v1037_v11 = vpop.f32.mrb[7].mxu0 }
 0x2c8   :  { %v382_v12 = vmul.f32 0.2, %v378_v10  ;;  %v383_v13 = vmax.f32 %v375_v6, %v381_v9 }
 0x2ca   :  { %v384_v14 = vmax.f32 %v378_v10, %v382_v12 }
 0x2cc   :  { %v385_v15 = vpack.c.bf16 %v384_v14, %v383_v13 }
 0x2ce   :  { %1055 = vmatmul.mubr.bf16.vlgmr.msra.gmra.mrb[4].mxu1 %v385_v15 }
 0x2cf   :  { %1094 = vmatprep.mubr.msk.bf16.mxu1 %vm1207_vm0, %v1206_v0  ;;  %1079 = vmatpush3.bf16.msra.mxu1 %v1163_v19 }
 0x2d0   :  { %1080 = vmatprep.subr.bf16.mxu1 %v1206_v0 }
 0x2d3   :  { %1081 = vmatpush3.bf16.msra.mxu1 %v1164_v20 }
 0x2d4   :  { %1082 = vmatprep.subr.bf16.mxu1 %v1206_v0 }
 0x2d7   :  { %1083 = vmatpush3.bf16.msra.mxu1 %v1165_v21 }
 0x2d8   :  { %1084 = vmatprep.subr.bf16.mxu1 %v1206_v0 }
 0x2db   :  { %1085 = vmatpush3.bf16.msra.mxu1 %v1166_v22 }
 0x2dc   :  { %1086 = vmatprep.subr.bf16.mxu1 %v1206_v0 }
 0x2df   :  { %1087 = vmatpush3.bf16.msra.mxu1 %v1167_v23 }
 0x2e0   :  { %1088 = vmatprep.subr.bf16.mxu1 %v1206_v0 }
 0x2e3   :  { %1089 = vmatpush3.bf16.msra.mxu1 %v1168_v36 }
 0x2e4   :  { %1090 = vmatprep.subr.bf16.mxu1 %v1206_v0 }
 0x2e7   :  { %1091 = vmatpush3.bf16.msra.mxu1 %v1169_v37 }
 0x2e8   :  { %1092 = vmatprep.subr.bf16.mxu1 %v1206_v0 }
 0x2eb   :  { %1093 = vmatpush3.bf16.msra.mxu1 %v1170_v38 }
 0x3a1   :  { %v490_v25 = vpop.f32.mrb[4].mxu1 }
 0x3a2   :  { %v491_v26 = vadd.f32 %v879_v24, %v490_v25  ;;  %v1056_v27 = vpop.f32.mrb[5].mxu1 }
 0x3a3   :  { %v493_v28 = vpop.f32.mrb[6].mxu1 }
 0x3a4   :  { %v497_v29 = vmul.f32 0.2, %v491_v26  ;;  %v494_v30 = vadd.f32 %v879_v24, %v493_v28  ;;  %v1057_v31 = vpop.f32.mrb[7].mxu1 }
 0x3a6   :  { %v498_v32 = vmul.f32 0.2, %v494_v30  ;;  %v499_v33 = vmax.f32 %v491_v26, %v497_v29 }
 0x3a8   :  { %v500_v34 = vmax.f32 %v494_v30, %v498_v32 }
 0x3aa   :  { %v501_v35 = vpack.c.bf16 %v500_v34, %v499_v33 }
 0x3ac   :  { %1075 = vmatmul.mubr.bf16.vlgmr.msra.gmra.mrb[8].mxu0 %v501_v35 }
 0x3ad   :  { %1114 = vmatprep.mubr.msk.bf16.mxu0 %vm1207_vm0, %v1206_v0  ;;  %1099 = vmatpush3.bf16.msra.mxu0 %v1171_v39 }
 0x3ae   :  { %1100 = vmatprep.subr.bf16.mxu0 %v1206_v0 }
 0x3b1   :  { %1101 = vmatpush3.bf16.msra.mxu0 %v1172_v40 }
 0x3b2   :  { %1102 = vmatprep.subr.bf16.mxu0 %v1206_v0 }
 0x3b5   :  { %1103 = vmatpush3.bf16.msra.mxu0 %v1173_v41 }
 0x3b6   :  { %1104 = vmatprep.subr.bf16.mxu0 %v1206_v0 }
 0x3b9   :  { %1105 = vmatpush3.bf16.msra.mxu0 %v1174_v42 }
 0x3ba   :  { %1106 = vmatprep.subr.bf16.mxu0 %v1206_v0 }
 0x3bd   :  { %1107 = vmatpush3.bf16.msra.mxu0 %v1175_v43 }
 0x3be   :  { %1108 = vmatprep.subr.bf16.mxu0 %v1206_v0 }
 0x3c1   :  { %1109 = vmatpush3.bf16.msra.mxu0 %v1176_v56 }
 0x3c2   :  { %1110 = vmatprep.subr.bf16.mxu0 %v1206_v0 }
 0x3c5   :  { %1111 = vmatpush3.bf16.msra.mxu0 %v1177_v57 }
 0x3c6   :  { %1112 = vmatprep.subr.bf16.mxu0 %v1206_v0  ;;  %v906_v0 = vld [vmem:[%s1351_s2 + $0x6] ss:$0 sm:$0xff] }
 0x3c9   :  { %1113 = vmatpush3.bf16.msra.mxu0 %v1178_v58 }
 0x47f   :  { %v606_v45 = vpop.f32.mrb[8].mxu0 }
 0x480   :  { %v607_v46 = vadd.f32 %v888_v44, %v606_v45  ;;  %v1076_v47 = vpop.f32.mrb[9].mxu0 }
 0x481   :  { %v609_v48 = vpop.f32.mrb[10].mxu0 }
 0x482   :  { %v613_v49 = vmul.f32 0.2, %v607_v46  ;;  %v610_v50 = vadd.f32 %v888_v44, %v609_v48  ;;  %v1077_v51 = vpop.f32.mrb[11].mxu0 }
 0x484   :  { %v614_v52 = vmul.f32 0.2, %v610_v50  ;;  %v615_v53 = vmax.f32 %v607_v46, %v613_v49 }
 0x486   :  { %v616_v54 = vmax.f32 %v610_v50, %v614_v52 }
 0x488   :  { %v617_v55 = vpack.c.bf16 %v616_v54, %v615_v53 }
 0x48a   :  { %1095 = vmatmul.mubr.bf16.vlgmr.msra.gmra.mrb[8].mxu1 %v617_v55 }
 0x55d   :  { %v722_v60 = vpop.f32.mrb[8].mxu1 }
 0x55e   :  { %v723_v61 = vadd.f32 %v897_v59, %v722_v60  ;;  %v1096_v62 = vpop.f32.mrb[9].mxu1 }
 0x55f   :  { %v725_v63 = vpop.f32.mrb[10].mxu1 }
 0x560   :  { %v729_v1 = vmul.f32 0.2, %v723_v61  ;;  %v726_v2 = vadd.f32 %v897_v59, %v725_v63  ;;  %v1097_v3 = vpop.f32.mrb[11].mxu1 }
 0x562   :  { %v730_v4 = vmul.f32 0.2, %v726_v2  ;;  %v731_v5 = vmax.f32 %v723_v61, %v729_v1 }
 0x564   :  { %v732_v6 = vmax.f32 %v726_v2, %v730_v4 }
 0x566   :  { %v733_v7 = vpack.c.bf16 %v732_v6, %v731_v5 }
 0x568   :  { %1115 = vmatmul.mubr.bf16.vlgmr.msra.gmra.mrb[12].mxu0 %v733_v7 }
 0x63b   :  { %v838_v8 = vpop.f32.mrb[12].mxu0 }
 0x63c   :  { %v839_v9 = vadd.f32 %v906_v0, %v838_v8  ;;  %v1116_v10 = vpop.f32.mrb[13].mxu0 }
 0x63d   :  { %v841_v11 = vpop.f32.mrb[14].mxu0 }
 0x63e   :  { %845 = vst.msk [vmem:[%s1352_s3] sm:$0xff] %vm33_vm1, %v839_v9  ;;  %v842_v12 = vadd.f32 %v906_v0, %v841_v11  ;;  %v1117_v13 = vpop.f32.mrb[15].mxu0 }
 0x640   :  { %846 = vst.msk [vmem:[%s1352_s3 + $0x8] sm:$0xff] %vm33_vm1, %v842_v12 }
 0x641   :  { %851 = vsyncpa [#allocation4], 1 }

</bundles_post_ra>
